<compile_context>
chip_gen: v7x
topology: tpu7x:2x2x1
jax: 0.10.0
libtpu: 0.0.40
codegen_flags: <defaults>
</compile_context>

<pallas_src>
import functools

import jax
import jax.numpy as jnp
from jax.experimental import pallas as pl
from jax.experimental.pallas import tpu as pltpu

NUM_CLASSES = 10
BOX_DIM = 7


def _round_up(x, m):
    return (x + m - 1) // m * m


def hybrid_loss_kernel(logits_ref, labels_ref, pred_ref, gt_ref,
                       ce_ref, sl1_ref, cnt_ref):
    # Resident accumulator outputs: zero at the start of each core's sweep.
    @pl.when(pl.program_id(1) == 0)
    def _init():
        ce_ref[...] = jnp.zeros_like(ce_ref)
        sl1_ref[...] = jnp.zeros_like(sl1_ref)
        cnt_ref[...] = jnp.zeros_like(cnt_ref)

    logits = logits_ref[...].astype(jnp.float32)      # (C, T): classes on sublanes
    labels = labels_ref[...]                          # (1, T): int32
    pred = pred_ref[...].astype(jnp.float32)          # (7, T)
    gt = gt_ref[...].astype(jnp.float32)              # (7, T)

    valid_f = (labels != -1).astype(jnp.float32)      # (1, T); padded cols are -1

    # ---- cross entropy with ignore_index=-1 (class axis = sublane axis 0) ----
    m = jnp.max(logits, axis=0, keepdims=True)                      # (1, T)
    z = logits - m
    lse = jnp.log(jnp.sum(jnp.exp(z), axis=0, keepdims=True))       # (1, T)
    class_ids = jax.lax.broadcasted_iota(jnp.int32, logits.shape, 0)
    picked = jnp.sum(jnp.where(class_ids == labels, z, 0.0),
                     axis=0, keepdims=True)                         # (1, T)
    ce = (lse - picked) * valid_f                                   # (1, T)

    # ---- smooth L1 (beta=1.0), summed over the 7 box dims per column ----
    d = pred - gt
    ad = jnp.abs(d)
    per = jnp.where(ad < 1.0, 0.5 * d * d, ad - 0.5)                # (7, T)
    sl1 = jnp.sum(per, axis=0, keepdims=True) * valid_f             # (1, T)

    # Per-lane accumulation; cross-lane collapse deferred to the wrapper.
    ce_ref[...] += ce
    sl1_ref[...] += sl1
    cnt_ref[...] += valid_f


@functools.partial(jax.jit, static_argnames=("max_tile", "num_cores"))
def hybrid_loss(cls_logits, reg_pred, gt_boxes, gt_labels, *,
                max_tile=8192, num_cores=2):
    """cls_logits: (B, M, num_classes); reg_pred/gt_boxes: (B, M, 7);
    gt_labels: (B, M) int (-1 = ignore).  Returns scalar f32 loss."""
    B, M, C = cls_logits.shape
    N = B * M

    # Tile the lane (N) axis; pad N so it splits evenly into num_cores groups
    # of n_tiles tiles of `tile` columns each.  At tile=8192 the per-step VMEM
    # footprint (double-buffered inputs + resident partials) is ~3 MiB.
    tile = min(max_tile, _round_up(pl.cdiv(N, num_cores), 128))
    n_tiles = pl.cdiv(N, num_cores * tile)
    n_pad = num_cores * n_tiles * tile
    pad = n_pad - N

    logits2d = cls_logits.reshape(N, C)
    pred2d = reg_pred.reshape(N, BOX_DIM)
    gt2d = gt_boxes.reshape(N, BOX_DIM)
    labels1d = gt_labels.reshape(N).astype(jnp.int32)

    # Lane-dense layout: features on sublanes, N on lanes. Padded rows get
    # label = -1 so they are masked out of every sum and the valid count.
    logits_t = jnp.pad(logits2d, ((0, pad), (0, 0))).T              # (C, n_pad)
    pred_t = jnp.pad(pred2d, ((0, pad), (0, 0))).T                  # (7, n_pad)
    gt_t = jnp.pad(gt2d, ((0, pad), (0, 0))).T                      # (7, n_pad)
    labels_t = jnp.pad(labels1d, (0, pad),
                       constant_values=-1).reshape(1, n_pad)        # (1, n_pad)

    def col_map(c, t):
        return (0, c * n_tiles + t)

    acc_spec = pl.BlockSpec((None, 1, tile), lambda c, t: (c, 0, 0))
    acc_shape = jax.ShapeDtypeStruct((num_cores, 1, tile), jnp.float32)

    grid_spec = pltpu.PrefetchScalarGridSpec(
        num_scalar_prefetch=0,
        grid=(num_cores, n_tiles),
        in_specs=[
            pl.BlockSpec((C, tile), col_map),
            pl.BlockSpec((1, tile), col_map),
            pl.BlockSpec((BOX_DIM, tile), col_map),
            pl.BlockSpec((BOX_DIM, tile), col_map),
        ],
        out_specs=[acc_spec, acc_spec, acc_spec],
    )

    ce_part, sl1_part, cnt_part = pl.pallas_call(
        hybrid_loss_kernel,
        out_shape=(acc_shape, acc_shape, acc_shape),
        grid_spec=grid_spec,
        compiler_params=pltpu.CompilerParams(
            dimension_semantics=("parallel", "arbitrary")),
    )(logits_t, labels_t, pred_t, gt_t)

    # Tiny final collapse + division outside the kernel.
    ce_sum = jnp.sum(ce_part)
    sl1_sum = jnp.sum(sl1_part)
    count = jnp.sum(cnt_part)
    safe = jnp.maximum(count, 1.0)
    total = ce_sum / safe + sl1_sum / (safe * float(BOX_DIM))
    return jnp.where(count > 0.0, total, jnp.zeros((), jnp.float32))


def hybrid_loss_ref(cls_logits, reg_pred, gt_boxes, gt_labels):
    """Pure-JAX reference matching the PyTorch HybridLoss semantics."""
    N = cls_logits.shape[0] * cls_logits.shape[1]
    logits = cls_logits.reshape(N, -1).astype(jnp.float32)
    pred = reg_pred.reshape(N, BOX_DIM).astype(jnp.float32)
    gt = gt_boxes.reshape(N, BOX_DIM).astype(jnp.float32)
    labels = gt_labels.reshape(N)
    valid = labels != -1
    count = jnp.sum(valid.astype(jnp.float32))
    logp = jax.nn.log_softmax(logits, axis=-1)
    picked = jnp.take_along_axis(
        logp, jnp.maximum(labels, 0)[:, None], axis=-1)[:, 0]
    ce_sum = jnp.sum(jnp.where(valid, -picked, 0.0))
    d = pred - gt
    ad = jnp.abs(d)
    per = jnp.where(ad < 1.0, 0.5 * d * d, ad - 0.5)
    sl1_sum = jnp.sum(per * valid[:, None].astype(jnp.float32))
    total = (ce_sum / jnp.maximum(count, 1.0)
             + sl1_sum / jnp.maximum(count * float(BOX_DIM), 1.0))
    return jnp.where(count > 0, total, 0.0)


if __name__ == "__main__":
    key = jax.random.PRNGKey(0)
    k1, k2, k3, k4 = jax.random.split(key, 4)

    B, M = 2, 20  # batch=2, max_objects=20
    cls_logits = jax.random.normal(k1, (B, M, NUM_CLASSES), dtype=jnp.float32)
    reg_pred = jax.random.normal(k2, (B, M, BOX_DIM), dtype=jnp.float32)
    gt_boxes = jax.random.normal(k3, (B, M, BOX_DIM), dtype=jnp.float32)
    # labels in [-1, 9]; -1 entries are ignored
    gt_labels = jax.random.randint(k4, (B, M), -1, NUM_CLASSES, dtype=jnp.int32)

    loss = hybrid_loss(cls_logits, reg_pred, gt_boxes, gt_labels)
    loss = jax.block_until_ready(loss)

    ref = hybrid_loss_ref(cls_logits, reg_pred, gt_boxes, gt_labels)
    assert jnp.allclose(loss, ref, rtol=1e-5, atol=1e-5), (loss, ref)

    print("KERNEL_OK")
</pallas_src>

<mosaic_0001>
module attributes {stable_mosaic.version = 11 : i64} {
  func.func @hybrid_loss_kernel(%arg0: i32, %arg1: i32, %arg2: memref<10x128xf32, #tpu.memory_space<vmem>>, %arg3: memref<1x128xi32, #tpu.memory_space<vmem>>, %arg4: memref<7x128xf32, #tpu.memory_space<vmem>>, %arg5: memref<7x128xf32, #tpu.memory_space<vmem>>, %arg6: memref<1x1x128xf32, #tpu.memory_space<vmem>>, %arg7: memref<1x1x128xf32, #tpu.memory_space<vmem>>, %arg8: memref<1x1x128xf32, #tpu.memory_space<vmem>>) attributes {dimension_semantics = [#tpu.dimension_semantics<parallel>, #tpu.dimension_semantics<arbitrary>], iteration_bounds = array<i64: 2, 1>, scalar_prefetch = 0 : i64, scratch_operands = 0 : i64, tpu.core_type = #tpu.core_type<tc>, window_params = [{transform_indices = @transform_0, window_bounds = array<i64: 10, 128>}, {transform_indices = @transform_1, window_bounds = array<i64: 1, 128>}, {transform_indices = @transform_2, window_bounds = array<i64: 7, 128>}, {transform_indices = @transform_3, window_bounds = array<i64: 7, 128>}, {transform_indices = @transform_4, window_bounds = array<i64: 1, 1, 128>}, {transform_indices = @transform_5, window_bounds = array<i64: 1, 1, 128>}, {transform_indices = @transform_6, window_bounds = array<i64: 1, 1, 128>}]} {
    %c0_i32 = arith.constant 0 : i32
    %0 = arith.cmpi eq, %arg1, %c0_i32 : i32
    %1 = arith.extui %0 : i1 to i32
    %c0_i32_0 = arith.constant 0 : i32
    %2 = arith.cmpi ne, %1, %c0_i32_0 : i32
    scf.if %2 {
      %cst_33 = arith.constant 0.000000e+00 : f32
      %59 = vector.broadcast %cst_33 : f32 to vector<1x128xf32>
      %c0_34 = arith.constant 0 : index
      %c0_35 = arith.constant 0 : index
      %c0_36 = arith.constant 0 : index
      %60 = vector.load %arg6[%c0_34, %c0_35, %c0_36] : memref<1x1x128xf32, #tpu.memory_space<vmem>>, vector<1x1x128xf32>
      %61 = vector.shape_cast %60 : vector<1x1x128xf32> to vector<1x128xf32>
      %62 = vector.shape_cast %59 : vector<1x128xf32> to vector<1x1x128xf32>
      tpu.vector_store %arg6[%c0_34, %c0_35, %c0_36], %62 {strides = array<i32>} : memref<1x1x128xf32, #tpu.memory_space<vmem>>, vector<1x1x128xf32>,
      %cst_37 = arith.constant 0.000000e+00 : f32
      %63 = vector.broadcast %cst_37 : f32 to vector<1x128xf32>
      %c0_38 = arith.constant 0 : index
      %c0_39 = arith.constant 0 : index
      %c0_40 = arith.constant 0 : index
      %64 = vector.load %arg7[%c0_38, %c0_39, %c0_40] : memref<1x1x128xf32, #tpu.memory_space<vmem>>, vector<1x1x128xf32>
      %65 = vector.shape_cast %64 : vector<1x1x128xf32> to vector<1x128xf32>
      %66 = vector.shape_cast %63 : vector<1x128xf32> to vector<1x1x128xf32>
      tpu.vector_store %arg7[%c0_38, %c0_39, %c0_40], %66 {strides = array<i32>} : memref<1x1x128xf32, #tpu.memory_space<vmem>>, vector<1x1x128xf32>,
      %cst_41 = arith.constant 0.000000e+00 : f32
      %67 = vector.broadcast %cst_41 : f32 to vector<1x128xf32>
      %c0_42 = arith.constant 0 : index
      %c0_43 = arith.constant 0 : index
      %c0_44 = arith.constant 0 : index
      %68 = vector.load %arg8[%c0_42, %c0_43, %c0_44] : memref<1x1x128xf32, #tpu.memory_space<vmem>>, vector<1x1x128xf32>
      %69 = vector.shape_cast %68 : vector<1x1x128xf32> to vector<1x128xf32>
      %70 = vector.shape_cast %67 : vector<1x128xf32> to vector<1x1x128xf32>
      tpu.vector_store %arg8[%c0_42, %c0_43, %c0_44], %70 {strides = array<i32>} : memref<1x1x128xf32, #tpu.memory_space<vmem>>, vector<1x1x128xf32>,
    } else {
    }
    %c0 = arith.constant 0 : index
    %c0_1 = arith.constant 0 : index
    %3 = vector.load %arg2[%c0, %c0_1] : memref<10x128xf32, #tpu.memory_space<vmem>>, vector<10x128xf32>
    %c0_2 = arith.constant 0 : index
    %c0_3 = arith.constant 0 : index
    %4 = vector.load %arg3[%c0_2, %c0_3] : memref<1x128xi32, #tpu.memory_space<vmem>>, vector<1x128xi32>
    %c0_4 = arith.constant 0 : index
    %c0_5 = arith.constant 0 : index
    %5 = vector.load %arg4[%c0_4, %c0_5] : memref<7x128xf32, #tpu.memory_space<vmem>>, vector<7x128xf32>
    %c0_6 = arith.constant 0 : index
    %c0_7 = arith.constant 0 : index
    %6 = vector.load %arg5[%c0_6, %c0_7] : memref<7x128xf32, #tpu.memory_space<vmem>>, vector<7x128xf32>
    %c-1_i32 = arith.constant -1 : i32
    %7 = vector.broadcast %c-1_i32 : i32 to vector<1x128xi32>
    %8 = arith.cmpi ne, %4, %7 : vector<1x128xi32>
    %9 = arith.extui %8 : vector<1x128xi1> to vector<1x128xi32>
    %10 = arith.sitofp %9 : vector<1x128xi32> to vector<1x128xf32>
    %cst = arith.constant dense<0xFF800000> : vector<128xf32>
    %11 = vector.multi_reduction <maximumf>, %3, %cst [0] : vector<10x128xf32> to vector<128xf32>
    %12 = vector.shape_cast %11 : vector<128xf32> to vector<1x128xf32>
    %13 = vector.broadcast %12 : vector<1x128xf32> to vector<10x128xf32>
    %14 = arith.subf %3, %13 : vector<10x128xf32>
    %15 = math.exp %14 : vector<10x128xf32>
    %cst_8 = arith.constant dense<0.000000e+00> : vector<128xf32>
    %16 = vector.multi_reduction <add>, %15, %cst_8 [0] : vector<10x128xf32> to vector<128xf32>
    %17 = vector.shape_cast %16 : vector<128xf32> to vector<1x128xf32>
    %18 = math.log %17 : vector<1x128xf32>
    %19 = tpu.iota {dimensions = array<i32: 0>} : vector<10x128xi32>
    %20 = vector.broadcast %4 : vector<1x128xi32> to vector<10x128xi32>
    %21 = arith.cmpi eq, %19, %20 : vector<10x128xi32>
    %cst_9 = arith.constant 0.000000e+00 : f32
    %22 = vector.broadcast %cst_9 : f32 to vector<10x128xf32>
    %23 = arith.select %21, %14, %22 : vector<10x128xi1>, vector<10x128xf32>
    %cst_10 = arith.constant dense<0.000000e+00> : vector<128xf32>
    %24 = vector.multi_reduction <add>, %23, %cst_10 [0] : vector<10x128xf32> to vector<128xf32>
    %25 = vector.shape_cast %24 : vector<128xf32> to vector<1x128xf32>
    %26 = arith.subf %18, %25 : vector<1x128xf32>
    %27 = arith.mulf %26, %10 : vector<1x128xf32>
    %28 = arith.subf %5, %6 : vector<7x128xf32>
    %29 = math.absf %28 : vector<7x128xf32>
    %cst_11 = arith.constant 1.000000e+00 : f32
    %30 = vector.broadcast %cst_11 : f32 to vector<7x128xf32>
    %31 = arith.cmpf olt, %29, %30 : vector<7x128xf32>
    %cst_12 = arith.constant 5.000000e-01 : f32
    %32 = vector.broadcast %cst_12 : f32 to vector<7x128xf32>
    %33 = arith.mulf %32, %28 : vector<7x128xf32>
    %34 = arith.mulf %33, %28 : vector<7x128xf32>
    %cst_13 = arith.constant 5.000000e-01 : f32
    %35 = vector.broadcast %cst_13 : f32 to vector<7x128xf32>
    %36 = arith.subf %29, %35 : vector<7x128xf32>
    %37 = arith.select %31, %34, %36 : vector<7x128xi1>, vector<7x128xf32>
    %cst_14 = arith.constant dense<0.000000e+00> : vector<128xf32>
    %38 = vector.multi_reduction <add>, %37, %cst_14 [0] : vector<7x128xf32> to vector<128xf32>
    %39 = vector.shape_cast %38 : vector<128xf32> to vector<1x128xf32>
    %40 = arith.mulf %39, %10 : vector<1x128xf32>
    %c0_15 = arith.constant 0 : index
    %c0_16 = arith.constant 0 : index
    %c0_17 = arith.constant 0 : index
    %41 = vector.load %arg6[%c0_15, %c0_16, %c0_17] : memref<1x1x128xf32, #tpu.memory_space<vmem>>, vector<1x1x128xf32>
    %42 = vector.shape_cast %41 : vector<1x1x128xf32> to vector<1x128xf32>
    %43 = arith.addf %42, %27 : vector<1x128xf32>
    %c0_18 = arith.constant 0 : index
    %c0_19 = arith.constant 0 : index
    %c0_20 = arith.constant 0 : index
    %44 = vector.load %arg6[%c0_18, %c0_19, %c0_20] : memref<1x1x128xf32, #tpu.memory_space<vmem>>, vector<1x1x128xf32>
    %45 = vector.shape_cast %44 : vector<1x1x128xf32> to vector<1x128xf32>
    %46 = vector.shape_cast %43 : vector<1x128xf32> to vector<1x1x128xf32>
    tpu.vector_store %arg6[%c0_18, %c0_19, %c0_20], %46 {strides = array<i32>} : memref<1x1x128xf32, #tpu.memory_space<vmem>>, vector<1x1x128xf32>,
    %c0_21 = arith.constant 0 : index
    %c0_22 = arith.constant 0 : index
    %c0_23 = arith.constant 0 : index
    %47 = vector.load %arg7[%c0_21, %c0_22, %c0_23] : memref<1x1x128xf32, #tpu.memory_space<vmem>>, vector<1x1x128xf32>
    %48 = vector.shape_cast %47 : vector<1x1x128xf32> to vector<1x128xf32>
    %49 = arith.addf %48, %40 : vector<1x128xf32>
    %c0_24 = arith.constant 0 : index
    %c0_25 = arith.constant 0 : index
    %c0_26 = arith.constant 0 : index
    %50 = vector.load %arg7[%c0_24, %c0_25, %c0_26] : memref<1x1x128xf32, #tpu.memory_space<vmem>>, vector<1x1x128xf32>
    %51 = vector.shape_cast %50 : vector<1x1x128xf32> to vector<1x128xf32>
    %52 = vector.shape_cast %49 : vector<1x128xf32> to vector<1x1x128xf32>
    tpu.vector_store %arg7[%c0_24, %c0_25, %c0_26], %52 {strides = array<i32>} : memref<1x1x128xf32, #tpu.memory_space<vmem>>, vector<1x1x128xf32>,
    %c0_27 = arith.constant 0 : index
    %c0_28 = arith.constant 0 : index
    %c0_29 = arith.constant 0 : index
    %53 = vector.load %arg8[%c0_27, %c0_28, %c0_29] : memref<1x1x128xf32, #tpu.memory_space<vmem>>, vector<1x1x128xf32>
    %54 = vector.shape_cast %53 : vector<1x1x128xf32> to vector<1x128xf32>
    %55 = arith.addf %54, %10 : vector<1x128xf32>
    %c0_30 = arith.constant 0 : index
    %c0_31 = arith.constant 0 : index
    %c0_32 = arith.constant 0 : index
    %56 = vector.load %arg8[%c0_30, %c0_31, %c0_32] : memref<1x1x128xf32, #tpu.memory_space<vmem>>, vector<1x1x128xf32>
    %57 = vector.shape_cast %56 : vector<1x1x128xf32> to vector<1x128xf32>
    %58 = vector.shape_cast %55 : vector<1x128xf32> to vector<1x1x128xf32>
    tpu.vector_store %arg8[%c0_30, %c0_31, %c0_32], %58 {strides = array<i32>} : memref<1x1x128xf32, #tpu.memory_space<vmem>>, vector<1x1x128xf32>,
    return
  }
  func.func @transform_0(%arg0: i32, %arg1: i32) -> (i32, i32) {
    %c1_i32 = arith.constant 1 : i32
    %0 = arith.muli %arg0, %c1_i32 : i32
    %1 = arith.addi %0, %arg1 : i32
    %c0_i32 = arith.constant 0 : i32
    %c0_i32_0 = arith.constant 0 : i32
    return %c0_i32, %1 : i32, i32
  }
  func.func @transform_1(%arg0: i32, %arg1: i32) -> (i32, i32) {
    %c1_i32 = arith.constant 1 : i32
    %0 = arith.muli %arg0, %c1_i32 : i32
    %1 = arith.addi %0, %arg1 : i32
    %c0_i32 = arith.constant 0 : i32
    %c0_i32_0 = arith.constant 0 : i32
    return %c0_i32, %1 : i32, i32
  }
  func.func @transform_2(%arg0: i32, %arg1: i32) -> (i32, i32) {
    %c1_i32 = arith.constant 1 : i32
    %0 = arith.muli %arg0, %c1_i32 : i32
    %1 = arith.addi %0, %arg1 : i32
    %c0_i32 = arith.constant 0 : i32
    %c0_i32_0 = arith.constant 0 : i32
    return %c0_i32, %1 : i32, i32
  }
  func.func @transform_3(%arg0: i32, %arg1: i32) -> (i32, i32) {
    %c1_i32 = arith.constant 1 : i32
    %0 = arith.muli %arg0, %c1_i32 : i32
    %1 = arith.addi %0, %arg1 : i32
    %c0_i32 = arith.constant 0 : i32
    %c0_i32_0 = arith.constant 0 : i32
    return %c0_i32, %1 : i32, i32
  }
  func.func @transform_4(%arg0: i32, %arg1: i32) -> (i32, i32, i32) {
    %c0_i32 = arith.constant 0 : i32
    %c0_i32_0 = arith.constant 0 : i32
    %c0_i32_1 = arith.constant 0 : i32
    return %arg0, %c0_i32, %c0_i32_0 : i32, i32, i32
  }
  func.func @transform_5(%arg0: i32, %arg1: i32) -> (i32, i32, i32) {
    %c0_i32 = arith.constant 0 : i32
    %c0_i32_0 = arith.constant 0 : i32
    %c0_i32_1 = arith.constant 0 : i32
    return %arg0, %c0_i32, %c0_i32_0 : i32, i32, i32
  }
  func.func @transform_6(%arg0: i32, %arg1: i32) -> (i32, i32, i32) {
    %c0_i32 = arith.constant 0 : i32
    %c0_i32_0 = arith.constant 0 : i32
    %c0_i32_1 = arith.constant 0 : i32
    return %arg0, %c0_i32, %c0_i32_0 : i32, i32, i32
  }
}

</mosaic_0001>

<bundles_post_ra>
// kernel: hybrid_loss.1
= control target key start
LH: loop header
LB: loop body
LE: loop exit
PB: predicated region body
PF: predicated region fallthrough
CT: control target
= control target key end

     0   :  { %s756_s21 = smov 0   ;;  %s758_s22 = smov 0   ;;  %s855_s0 = inlined_call_operand.vmem [shape: f32[10,256], index: 0, kind: input, shape index: {}]   ;;  %s856_s1 = inlined_call_operand.vmem [shape: s32[1,256], index: 1, kind: input, shape index: {}]   ;;  %s857_s2 = inlined_call_operand.vmem [shape: f32[7,256], index: 2, kind: input, shape index: {}]   ;;  %s858_s3 = inlined_call_operand.vmem [shape: f32[7,256], index: 3, kind: input, shape index: {}]   ;;  %s859_s4 = inlined_call_operand.vmem [shape: f32[2,1,128], index: 4, kind: output, shape index: {0}]   ;;  %s860_s5 = inlined_call_operand.vmem [shape: f32[2,1,128], index: 5, kind: output, shape index: {1}]   ;;  %s861_s6 = inlined_call_operand.vmem [shape: f32[2,1,128], index: 6, kind: output, shape index: {2}]  }
   0x1   :  { %s760_s23 = smov 0   ;;  %s762_s24 = smov 0  }
   0x2   :  { %s764_s25 = smov 0  }
   0x3 LB: > { %s29_s26 = sadd.s32 1, %s714_s24  ;;  %p45_p1 = scmp.ne.s32.totalorder %s706_s22, %s702_s21  ;;  %s718_s25 = sphi %s764_s25, %s17_s25   ;;  %s714_s24 = sphi %s762_s24, %s865_s24   ;;  %s710_s23 = sphi %s760_s23, %s864_s23   ;;  %s706_s22 = sphi %s758_s22, %s863_s22   ;;  %s702_s21 = sphi %s756_s21, %s862_s21  }
   0x4   : > { %p31_p0 = scmp.ge.s32.totalorder %s29_s26, 2  ;;  %p46_p2 = scmp.eq.s32.totalorder %s718_s25, 0 }
   0x5   : > { %s38_s28 = sadd.s32 1, %s706_s22  ;;  %p622_p5 = scmp.ge.s32.totalorder %s718_s25, 2 }
   0x6   : > { %s867_s26 = smov (%p31_p0, %s29_s26), 0  ;;  %p47_p3 = por %p46_p2, %p45_p1 }
   0x7   : > { %s35_s27 = ssub.s32 %s714_s24, %s867_s26  ;;  %233 = sbr.rel (%p622_p5) target bundleno = 21 (0x15), region = 16 }
   0x8   : > { %p36_p4 = scmp.eq.s32.totalorder %s35_s27, 0 }
   0xa   : > { %s791_s29 = scalar_select %p36_p4, %s706_s22, %s38_s28  }
   0xe   : > { %236 = sbr.rel (!%p47_p3) target bundleno = 21 (0x15), region = 20  ;;  %s238_s30 = sand.u32 (%p47_p3), 1, %s706_s22  }
   0xf   : > { %s624_s7 = sshll.u32 (%p47_p3), %s714_s24, 3  ;;  %s623_s8 = sshll.u32 (%p47_p3), %s238_s30, 4 }
  0x10   : > { %s243_s11 = scalar_lea.vmem (%p47_p3), %s855_s0, %s624_s7  ;;  %s240_s12 = scalar_lea.vmem (%p47_p3), [#allocation2], %s623_s8 }
  0x11   : > { %v273_v0 = vld [vmem:[%s243_s11] sm:$0xff] (%p47_p3)  ;;  %v275_v1 = vld [vmem:[%s243_s11 + $0x10] sm:$0xff] (%p47_p3) }
  0x12   : > { %274 = vst [vmem:[%s240_s12] sm:$0xff] (%p47_p3), %v273_v0  ;;  %276 = vst [vmem:[%s240_s12 + $0x8] sm:$0xff] (%p47_p3), %v275_v1 }
  0x15 PF: > { %p625_p6 = scmp.ge.s32.totalorder %s718_s25, 1  ;;  %p307_p7 = scmp.lt.s32.totalorder %s718_s25, 3 }
  0x17   : > { %p308_p8 = pnand %p625_p6, %p307_p7 }
  0x18   : > { %s314_s13 = sand.u32 (!%p308_p8), 1, %s702_s21   ;;  %p363_p9 = scmp.lt.s32.totalorder (!%p308_p8), %s710_s23, 1  ;;  %vm403_vm0 = vcmask (!%p308_p8), 1041408   ;;  %v720_v6 = vmov (!%p308_p8), 0.0   ;;  %v428_v9 = vlaneseq (!%p308_p8)  ;;  %vm456_vm2 = vcmask (!%p308_p8), 1046528  }
  0x19   : > { %311 = sbr.rel (%p308_p8) target bundleno = 95 (0x5f), region = 70  ;;  %s626_s14 = sshll.u32 (!%p308_p8), %s314_s13, 4 }
  0x1a   : > { %s316_s15 = scalar_lea.vmem (!%p308_p8), [#allocation2], %s626_s14  ;;  %v429_v18 = vshrl.u32 (!%p308_p8), %v428_v9, 7 }
  0x1b   : > { %v395_v2 = vld [vmem:[%s316_s15] sm:$0xff] (!%p308_p8)  ;;  %v396_v3 = vld [vmem:[%s316_s15 + $0x8] sm:$0x3] (!%p308_p8) }
  0x1c   : > { %v404_v4 = vsel (!%p308_p8), %vm403_vm0, %v396_v3, -inf  ;;  %v433_v28 = vsub.s32 (!%p308_p8), 0, %v429_v18  ;;  %v430_v35 = vadd.s32 (!%p308_p8), 8, %v429_v18 }
  0x1d   : > { %v405_v5 = vmax.f32 (!%p308_p8), %v395_v2, %v404_v4 }
  0x1f   : > { %v406_v7 = vrot.slane (!%p308_p8), %v405_v5, 4 }
  0x20   : > { %s869_s23 = smov (!%p363_p9, %s710_s23), 1 }
  0x21   : > { %s808_s18 = scalar_lea.vmem %s859_s4, %s869_s23  ;;  %s814_s21 = scalar_lea.vmem %s860_s5, %s869_s23  ;;  %v407_v8 = vmax.f32 %v405_v5, %v406_v7 }
  0x22   : > { %392 = vst [vmem:[%s808_s18] sm:$0x1] %v720_v6  ;;  %s819_s30 = scalar_lea.vmem %s861_s6, %s869_s23  ;;  %s365_s9 = scalar_lea.vmem %s856_s1, %s869_s23  ;;  %393 = vst [vmem:[%s814_s21] sm:$0x1] %v720_v6 }
  0x23   : > { %394 = vst [vmem:[%s819_s30] sm:$0x1] %v720_v6  ;;  %s627_s10 = sshll.u32 %s869_s23, 3  ;;  %v397_v12 = vld [vmem:[%s365_s9] sm:$0x1]  ;;  %v408_v14 = vrot.slane %v407_v8, 2 }
  0x24   : > { %s371_s13 = scalar_lea.vmem %s857_s2, %s627_s10  ;;  %s377_s16 = scalar_lea.vmem %s858_s3, %s627_s10  ;;  %vm400_vm1 = vcmp.ne.s32.totalorder %v397_v12, 4294967295  ;;  %v434_v36 = vrot.slane %v397_v12, %v433_v28 }
  0x25   : > { %v398_v10 = vld [vmem:[%s371_s13] sm:$0x7f]  ;;  %v409_v17 = vmax.f32 %v407_v8, %v408_v14  ;;  %v629_v19 = vsel %vm400_vm1, 1.0, %v720_v6 }
  0x26   : > { %v399_v11 = vld [vmem:[%s377_s16] sm:$0x7f]  ;;  %vm436_vm4 = vcmp.eq.s32.totalorder %v430_v35, %v434_v36  ;;  %vm435_vm5 = vcmp.eq.s32.totalorder %v429_v18, %v434_v36 }
  0x27   : > { %v449_v13 = vsub.f32 %v398_v10, %v399_v11  ;;  %v410_v23 = vrot.slane %v409_v17, 1 }
  0x29   : > { %v450_v15 = vand.u32 2147483647, %v449_v13  ;;  %v452_v16 = vmul.f32 0.5, %v449_v13  ;;  %v411_v26 = vmax.f32 %v409_v17, %v410_v23  ;;  %v468_v42 = vld [vmem:[%s814_s21] sm:$0x1] }
  0x2a   : > { %v471_v22 = vld [vmem:[%s819_s30] sm:$0x1] }
  0x2b   : > { %vm451_vm3 = vcmp.lt.f32.partialorder %v450_v15, 1.0  ;;  %v453_v20 = vmul.f32 %v452_v16, %v449_v13  ;;  %v630_v21 = vadd.f32 -0.5, %v450_v15  ;;  %v472_v24 = vadd.f32 %v629_v19, %v471_v22 }
  0x2c   : > { %v412_v30 = vsub.f32 %v395_v2, %v411_v26  ;;  %v413_v31 = vsub.f32 %v396_v3, %v411_v26  ;;  %v465_v3 = vld [vmem:[%s808_s18] sm:$0x1] }
  0x2d   : > { %v455_v25 = vsel %vm451_vm3, %v453_v20, %v630_v21  ;;  %473 = vst [vmem:[%s819_s30] sm:$0x1] %v472_v24 }
  0x2e   : > { %v457_v27 = vsel %vm456_vm2, %v455_v25, 0.0  ;;  %v414_v33 = vmul.f32 1.442695, %v412_v30  ;;  %v416_v34 = vmul.f32 1.442695, %v413_v31  ;;  %v438_v41 = vsel %vm436_vm4, %v413_v31, 0.0 }
  0x2f   : > { %v458_v29 = vrot.slane %v457_v27, 4  ;;  %v437_v44 = vsel %vm435_vm5, %v412_v30, 0.0  ;;  %v439_v45 = vsel %vm403_vm0, %v438_v41, 0.0 }
  0x30   : > { %674 = vpow2.f32 %v414_v33  ;;  %v440_v50 = vadd.f32 %v439_v45, %v437_v44 }
  0x31   : > { %v459_v32 = vadd.f32 %v458_v29, %v457_v27  ;;  %676 = vpow2.f32 %v416_v34 }
  0x32   : > { %v441_v53 = vrot.slane %v440_v50, 4 }
  0x33   : > { %v460_v37 = vrot.slane %v459_v32, 2 }
  0x34   : > { %v442_v56 = vadd.f32 %v441_v53, %v440_v50 }
  0x35   : > { %v461_v38 = vadd.f32 %v460_v37, %v459_v32 }
  0x36   : > { %v443_v59 = vrot.slane %v442_v56, 2 }
  0x37   : > { %v462_v39 = vrot.slane %v461_v38, 1 }
  0x38   : > { %v444_v61 = vadd.f32 %v443_v59, %v442_v56 }
  0x39   : > { %v463_v40 = vadd.f32 %v462_v39, %v461_v38 }
  0x3a   : > { %v675_v47 = vpop.eup %674  ;;  %v445_v62 = vrot.slane %v444_v61, 1 }
  0x3b   : > { %v464_v43 = vmul.f32 %v629_v19, %v463_v40  ;;  %v677_v48 = vpop.eup %676 }
  0x3c   : > { %v418_v49 = vsel %vm403_vm0, %v677_v48, 0.0  ;;  %v446_v63 = vadd.f32 %v445_v62, %v444_v61 }
  0x3d   : > { %v469_v46 = vadd.f32 %v468_v42, %v464_v43  ;;  %v419_v51 = vadd.f32 %v675_v47, %v418_v49 }
  0x3f   : > { %470 = vst [vmem:[%s814_s21] sm:$0x1] %v469_v46  ;;  %v420_v52 = vrot.slane %v419_v51, 4 }
  0x41   : > { %v421_v54 = vadd.f32 %v420_v52, %v419_v51 }
  0x43   : > { %v422_v55 = vrot.slane %v421_v54, 2 }
  0x45   : > { %v423_v57 = vadd.f32 %v422_v55, %v421_v54 }
  0x47   : > { %v424_v58 = vrot.slane %v423_v57, 1 }
  0x49   : > { %v425_v60 = vadd.f32 %v424_v58, %v423_v57 }
  0x4b   : > { %678 = vlog2.f32 %v425_v60 }
  0x55   : > { %v679_v0 = vpop.eup %678 }
  0x56   : > { %v427_v1 = vmul.f32 0.6931472, %v679_v0 }
  0x58   : > { %v447_v2 = vsub.f32 %v427_v1, %v446_v63 }
  0x5a   : > { %v448_v4 = vmul.f32 %v629_v19, %v447_v2 }
  0x5c   : > { %v466_v5 = vadd.f32 %v465_v3, %v448_v4 }
  0x5e   : > { %467 = vst [vmem:[%s808_s18] sm:$0x1] %v466_v5 }
  0x5f PF: > { %s17_s25 = sadd.s32 1, %s718_s25   ;;  %s862_s21 = smov %s706_s22 }
  0x60   : > { %p14_p10 = scmp.ge.s32.totalorder %s17_s25, 4   ;;  %s863_s22 = smov %s791_s29 }
  0x61   : > { %s864_s23 = smov %s714_s24  ;;  %s865_s24 = smov %s867_s26 }
  0x62   :  { %16 = sbr.rel (!%p14_p10) target bundleno = 3 (0x3), region = 146 }

</bundles_post_ra>
